<compile_context>
chip_gen: v7x
topology: tpu7x:2x2x1
jax: 0.10.0
libtpu: 0.0.40
codegen_flags: <defaults>
</compile_context>

<pallas_src>
import jax
import jax.numpy as jnp
from jax.experimental import pallas as pl
from jax.experimental.pallas import tpu as pltpu


def _dropsample_kernel(x_ref, scale_ref, o_ref):
    # Per-row f32 scale column broadcast across the lane-dense feature axis;
    # single cast on the way out.
    o_ref[...] = (x_ref[...] * scale_ref[...]).astype(o_ref.dtype)


def _sublane_multiple(itemsize):
    # Sub-32-bit dtypes pack along sublanes: fully packed tiles need 16 rows
    # for bf16/fp16 and 32 rows for int8/fp8 to keep loads/stores unmasked.
    if itemsize >= 4:
        return 8
    if itemsize == 2:
        return 16
    return 32


def _sublane_fill_factor(B, F, sub):
    """Pick s so (B, F) can be viewed as (B*s, F//s) with full sublanes
    (B*s >= sub) while keeping the lane axis a multiple of 128."""
    if B >= sub or F < 256:
        return 1
    best = 1
    for cand in range(2, min(F, 8 * sub) + 1):
        if F % cand != 0:
            continue
        if (F // cand) % 128 != 0:
            continue
        best = cand
        if B * cand >= sub:
            return cand
    return best


def _choose_tiles(B2, F2, itemsize, sub):
    # ~3 MiB data blocks: >=85% of measured HBM roofline; 2x(in)+2x(out)
    # double buffers (~12 MiB) fit v5e's 16 MiB scoped default and v6e/v7x's
    # 32 MiB scoped default (v7x has 64 MiB physical VMEM per TC).
    TARGET = 3 * 1024 * 1024

    # Lane (feature) tile: whole axis if it fits, else the largest multiple
    # of 128 such that a minimal-height (sub-row) block stays under TARGET.
    max_tf = max(128, (TARGET // (sub * itemsize)) // 128 * 128)
    tf = F2 if F2 <= max_tf else max_tf

    # Sublane (row) tile: grow toward TARGET when the feature axis is small,
    # in dtype-packed multiples of `sub`.
    max_bt = max(sub, (TARGET // (tf * itemsize)) // sub * sub)
    bt = B2 if B2 <= max_bt else max_bt

    # v7x megacore: guarantee >=2 parallel grid steps for non-trivial inputs
    # so both TensorCores stream their share of HBM bandwidth.
    total_bytes = B2 * F2 * itemsize
    if pl.cdiv(B2, bt) * pl.cdiv(F2, tf) == 1 and total_bytes > (512 * 1024):
        if F2 >= 256:
            tf = ((F2 // 2 + 127) // 128) * 128
        elif B2 >= 2 * sub:
            bt = max(sub, ((B2 // 2 + sub - 1) // sub) * sub)

    return bt, tf


def dropsample(x, prob=0.0, *, key=None, training=True):
    """Pallas TPU Dropsample.  x is NCHW (any trailing shape works).
    `prob` must be a static Python float."""
    if prob == 0.0 or not training:
        return x
    if key is None:
        key = jax.random.PRNGKey(0)

    B = x.shape[0]
    F = 1
    for d in x.shape[1:]:
        F *= d

    # Per-sample keep/scale, decided once outside the kernel (tiny XLA op).
    # Keep iff u > prob; kept rows rescaled by 1/(1-prob), dropped rows -> 0.
    u = jax.random.uniform(key, (B, 1), dtype=jnp.float32)
    scale = jnp.where(u > prob,
                      jnp.float32(1.0 / (1.0 - prob)),
                      jnp.float32(0.0))

    itemsize = x.dtype.itemsize
    sub = _sublane_multiple(itemsize)

    # Small-batch sublane fill: view (B, F) as (B*s, F//s); the per-row scale
    # is repeated s times so it follows the row split (row-major reshape).
    s = _sublane_fill_factor(B, F, sub)
    B2, F2 = B * s, F // s
    x2 = x.reshape(B2, F2)
    scale2 = jnp.repeat(scale, s, axis=0) if s > 1 else scale

    bt, tf = _choose_tiles(B2, F2, itemsize, sub)
    grid = (pl.cdiv(B2, bt), pl.cdiv(F2, tf))

    block_bytes = bt * tf * itemsize
    vmem_limit = min(48 * 1024 * 1024,
                     max(16 * 1024 * 1024, 4 * block_bytes + 2 * 1024 * 1024))

    out2 = pl.pallas_call(
        _dropsample_kernel,
        out_shape=jax.ShapeDtypeStruct((B2, F2), x.dtype),
        grid=grid,
        in_specs=[
            pl.BlockSpec((bt, tf), lambda i, j: (i, j)),   # data slab
            pl.BlockSpec((bt, 1), lambda i, j: (i, 0)),    # per-row scale
        ],
        out_specs=pl.BlockSpec((bt, tf), lambda i, j: (i, j)),
        compiler_params=pltpu.CompilerParams(
            dimension_semantics=("parallel", "parallel"),
            vmem_limit_bytes=vmem_limit),
    )(x2, scale2)

    return out2.reshape(x.shape)


def _dropsample_ref(x, prob, key):
    # Pure-JAX reference with the same per-sample RNG draw as the wrapper.
    B = x.shape[0]
    u = jax.random.uniform(key, (B, 1), dtype=jnp.float32)
    keep = jnp.where(u > prob, jnp.float32(1.0 / (1.0 - prob)), jnp.float32(0.0))
    y = x.reshape(B, -1).astype(jnp.float32) * keep
    return y.astype(x.dtype).reshape(x.shape)


if __name__ == "__main__":
    key = jax.random.PRNGKey(0)
    kx, kd, kx2, kd2 = jax.random.split(key, 4)

    B, C, H, W = 2, 4, 16, 16
    x = jax.random.normal(kx, (B, C, H, W), dtype=jnp.float32)

    # Eval / prob == 0 path: identity.
    y_eval = dropsample(x, prob=0.0, training=False)
    y_eval = jax.block_until_ready(y_eval)
    assert jnp.allclose(y_eval, x)

    # Training path with prob > 0: run the Pallas kernel (f32, tiny batch ->
    # exercises the sublane-fill reshape).
    prob = 0.5
    y = dropsample(x, prob=prob, key=kd, training=True)
    y = jax.block_until_ready(y)

    # Reference check: each sample is either fully dropped or kept & rescaled.
    u_ref = jax.random.uniform(kd, (B, 1), dtype=jnp.float32)
    keep_ref = (u_ref > prob).reshape(B)
    for b in range(B):
        if bool(keep_ref[b]):
            assert jnp.allclose(y[b], x[b] / (1.0 - prob), rtol=1e-6, atol=1e-6), \
                f"sample {b} kept but not rescaled correctly"
        else:
            assert bool(jnp.all(y[b] == 0.0)), f"sample {b} dropped but not zero"

    # Second check: bf16 input (dtype-aware sublane tiling path) vs reference.
    xb = jax.random.normal(kx2, (16, 8, 32, 32), dtype=jnp.bfloat16)
    yb = dropsample(xb, prob=0.25, key=kd2, training=True)
    yb = jax.block_until_ready(yb)
    yb_ref = _dropsample_ref(xb, 0.25, kd2)
    assert jnp.allclose(yb.astype(jnp.float32), yb_ref.astype(jnp.float32),
                        rtol=1e-2, atol=1e-2)

    print("KERNEL_OK")
</pallas_src>

<mosaic_0001>
module attributes {stable_mosaic.version = 11 : i64} {
  func.func @_dropsample_kernel(%arg0: i32, %arg1: i32, %arg2: memref<8x256xf32, #tpu.memory_space<vmem>>, %arg3: memref<8x1xf32, #tpu.memory_space<vmem>>, %arg4: memref<8x256xf32, #tpu.memory_space<vmem>>) attributes {dimension_semantics = [#tpu.dimension_semantics<parallel>, #tpu.dimension_semantics<parallel>], iteration_bounds = array<i64: 1, 1>, scalar_prefetch = 0 : i64, scratch_operands = 0 : i64, tpu.core_type = #tpu.core_type<tc>, window_params = [{transform_indices = @transform_0, window_bounds = array<i64: 8, 256>}, {transform_indices = @transform_1, window_bounds = array<i64: 8, 1>}, {transform_indices = @transform_2, window_bounds = array<i64: 8, 256>}]} {
    %c0 = arith.constant 0 : index
    %c0_0 = arith.constant 0 : index
    %0 = vector.load %arg2[%c0, %c0_0] : memref<8x256xf32, #tpu.memory_space<vmem>>, vector<8x256xf32>
    %c0_1 = arith.constant 0 : index
    %c0_2 = arith.constant 0 : index
    %1 = vector.load %arg3[%c0_1, %c0_2] : memref<8x1xf32, #tpu.memory_space<vmem>>, vector<8x1xf32>
    %2 = vector.broadcast %1 : vector<8x1xf32> to vector<8x256xf32>
    %3 = arith.mulf %0, %2 : vector<8x256xf32>
    %c0_3 = arith.constant 0 : index
    %c0_4 = arith.constant 0 : index
    %4 = vector.load %arg4[%c0_3, %c0_4] : memref<8x256xf32, #tpu.memory_space<vmem>>, vector<8x256xf32>
    tpu.vector_store %arg4[%c0_3, %c0_4], %3 {strides = array<i32>} : memref<8x256xf32, #tpu.memory_space<vmem>>, vector<8x256xf32>,
    return
  }
  func.func @transform_0(%arg0: i32, %arg1: i32) -> (i32, i32) {
    %c0_i32 = arith.constant 0 : i32
    return %arg0, %arg1 : i32, i32
  }
  func.func @transform_1(%arg0: i32, %arg1: i32) -> (i32, i32) {
    %c0_i32 = arith.constant 0 : i32
    %c0_i32_0 = arith.constant 0 : i32
    return %arg0, %c0_i32 : i32, i32
  }
  func.func @transform_2(%arg0: i32, %arg1: i32) -> (i32, i32) {
    %c0_i32 = arith.constant 0 : i32
    return %arg0, %arg1 : i32, i32
  }
}

</mosaic_0001>

<bundles_post_ra>
// kernel: tpu_custom_call.1
= control target key start
LH: loop header
LB: loop body
LE: loop exit
PB: predicated region body
PF: predicated region fallthrough
CT: control target
= control target key end

     0   :  { %7 = vsyncpa [#allocation3], 0  ;;  %s148_s0 = inlined_call_operand.hbm [shape: f32[8,256], index: 0, kind: input, shape index: {}]   ;;  %s149_s1 = inlined_call_operand.vmem [shape: f32[8,1], index: 1, kind: input, shape index: {}]   ;;  %s150_s2 = inlined_call_operand.hbm [shape: f32[8,256], index: 2, kind: output, shape index: {}]  }
   0x1   :  { %8 = vsyncpa [#allocation4], 0  ;;  %s103_s9 = smov [#allocation2]   ;;  %s55_s13 = scalar_lea.hbm %s148_s0, 256 }
   0x2   :  { %s15_s10 = sshll.u32 %s103_s9, 4  ;;  %p56_p0 = scmp.ne.s32.totalorder %s148_s0, %s55_s13  ;;  %s16_s10 = int_to_ptr.vmem [resolvable:$true] %s15_s10 }
   0x3   :  { %p59_p1 = scmp.lt.u32.totalorder %s55_s13, %s148_s0 }
   0x5   :  { %p61_p2 = pnand %p59_p1, %p56_p0 }
   0x7   :  { %64 = shalt.err (!%p61_p2)
}
   0x8   :  { %s65_s18 = scalar_lea.vmem %s16_s10, 256  ;;  %p70_p4 = scmp.lt.s32.totalorder %s16_s10, %s16_s10 }
   0x9   :  { %p66_p3 = scmp.ne.s32.totalorder %s16_s10, %s65_s18  ;;  %p71_p5 = scmp.lt.s32.totalorder %s65_s18, %s65_s18 }
   0xb   :  { %p72_p6 = por %p71_p5, %p70_p4 }
   0xd   :  { %p73_p7 = pnand %p72_p6, %p66_p3 }
   0xf   :  { %76 = shalt.err (!%p73_p7)
}
  0x10   :  { %18 = dma.hbm_to_vmem [thread:$0]  %s148_s0, 256, %s16_s10, [#allocation3]  }
  0x11   :  { %99 = dma.done.wait [#allocation3], 256  }
  0x12   :  { %100 = vsyncadd [#allocation3], 4294967040  ;;  %v104_v0 = vmov 0   ;;  %v26_v1 = vld [vmem:[%s149_s1] sm:$0xff]  ;;  %v25_v3 = vld [vmem:[#allocation2 + $0x8] sm:$0xff]  ;;  %s105_s23 = smov [#allocation5]  }
  0x13   :  { %54 = vset.pattern.permute.xlu0 %v104_v0  ;;  %v24_v2 = vld [vmem:[#allocation2] sm:$0xff]  ;;  %s42_s24 = sshll.u32 %s105_s23, 4  ;;  %s43_s24 = int_to_ptr.vmem [resolvable:$true] %s42_s24 }
  0x14   :  { %29 = vperm.xlu0 %54, %v26_v1   ;;  %s77_s0 = scalar_lea.vmem %s43_s24, 256  ;;  %p82_p9 = scmp.lt.s32.totalorder %s43_s24, %s43_s24 }
  0x15   :  { %p78_p8 = scmp.ne.s32.totalorder %s43_s24, %s77_s0  ;;  %p83_p10 = scmp.lt.s32.totalorder %s77_s0, %s77_s0 }
  0x17   :  { %p84_p11 = por %p83_p10, %p82_p9 }
  0x19   :  { %p85_p12 = pnand %p84_p11, %p78_p8 }
  0x93   :  { %v30_v4 = vpop.permute.xlu0 %29 }
  0x94   :  { %v32_v5 = vmul.f32 %v30_v4, %v24_v2  ;;  %v33_v6 = vmul.f32 %v30_v4, %v25_v3 }
  0x96   :  { %34 = vst [vmem:[#allocation5] sm:$0xff] %v32_v5  ;;  %35 = vst [vmem:[#allocation5 + $0x8] sm:$0xff] %v33_v6 }
  0x97   :  { %88 = shalt.err (!%p85_p12)
}
  0x98   :  { %s89_s26 = scalar_lea.hbm %s150_s2, 256 }
  0x99   :  { %p90_p13 = scmp.ne.s32.totalorder %s150_s2, %s89_s26  ;;  %p93_p0 = scmp.lt.u32.totalorder %s89_s26, %s150_s2 }
  0x9b   :  { %p95_p1 = pnand %p93_p0, %p90_p13 }
  0x9d   :  { %98 = shalt.err (!%p95_p1)
}
  0x9e   :  { %45 = dma.vmem_to_hbm [thread:$0]  %s43_s24, 256, %s150_s2, [#allocation4]  }
  0x9f   :  { %101 = dma.done.wait [#allocation4], 256  }
  0xa0   :  { %102 = vsyncadd [#allocation4], 4294967040 }
  0xa1   :  { %49 = vsyncpa [#allocation3], 1 }
  0xa2   :  { %50 = vsyncpa [#allocation4], 1 }

</bundles_post_ra>
